<compile_context>
chip_gen: v7x
topology: tpu7x:2x2x1
jax: 0.10.0
libtpu: 0.0.40
codegen_flags: <defaults>
</compile_context>

<pallas_src>
import jax
import jax.numpy as jnp
from jax.experimental import pallas as pl
from jax.experimental.pallas import tpu as pltpu

# ---- module hyper-parameters (from Train.py) --------------------------------
NUM_VARS = 64        # `numVars` = adjacencyMatricesAsVecs.shape[0] (synthetic choice)
NUM_HIDDEN = 32
NUM_LATENT = 16
BATCH = 8

# ---- lane packing / packed-parameter slab layout -----------------------------
PACK = 4                          # samples packed per lane row: 4 -> 128 lanes
                                  # (native for v5e MXU; use 8 on v6e/v7x 256x256 MXU)
SLAB_COLS = PACK * NUM_HIDDEN     # 128 -> every slab / output access is lane dense


def _round_up(x, m):
    return ((x + m - 1) // m) * m


def _slab_layout(pack):
    """Row offsets of each packed parameter region (all multiples of 8)."""
    off, r = {}, 0
    off["w1"] = r; r += pack * NUM_VARS        # (pack*64, pack*32) block-diagonal
    off["b1"] = r; r += 8                      # (1, pack*32) tiled bias
    for w, b in (("w2", "b2"), ("w3", "b3"), ("w4", "b4"), ("wh", "bh")):
        off[w] = r; r += pack * NUM_HIDDEN     # (pack*32, pack*32) block-diagonal
        off[b] = r; r += 8
    return off, r


OFF, SLAB_ROWS = _slab_layout(PACK)            # 808 rows x 128 cols f32 (~0.4 MiB)

# ---- batch tiling -------------------------------------------------------------
_BLOCK_M = 2048       # packed rows per grid step (= PACK*2048 = 8192 samples)
_SPLIT_MIN = 128      # once there is this much packed work, use >= 2 grid steps
                      # so v7x's two TensorCores both get a tile


def _choose_tile(mp_need):
    if mp_need <= _SPLIT_MIN:
        return _round_up(max(mp_need, 1), 8)
    return min(_BLOCK_M, _round_up(-(-mp_need // 2), 8))


# ---- kernel -------------------------------------------------------------------
def _encoder_kernel(x_ref, p_ref, out_ref):
    """Whole forward pass for one packed batch tile; params live in one slab."""

    def linear(h, w_name, w_rows, b_name):
        w = p_ref[OFF[w_name]:OFF[w_name] + w_rows, :]   # static slab slice
        b = p_ref[OFF[b_name]:OFF[b_name] + 1, :]        # (1, 128) bias row
        return jnp.dot(h, w, preferred_element_type=jnp.float32) + b

    kw = PACK * NUM_HIDDEN
    h = jnp.tanh(linear(x_ref[...], "w1", PACK * NUM_VARS, "b1"))
    h = jnp.tanh(linear(h, "w2", kw, "b2"))
    h = jnp.tanh(linear(h, "w3", kw, "b3"))
    z = linear(h, "w4", kw, "b4")          # per-sample cols [16:32] are exact zeros
    heads = linear(z, "wh", kw, "bh")      # per-sample layout: [mu(16) | logvar(16)]
    out_ref[...] = heads.astype(out_ref.dtype)   # (tm, 128): unmasked, lane-dense vst


# ---- wrapper ------------------------------------------------------------------
@jax.jit
def encoder_forward(x, slab):
    """x: (B, NUM_VARS) f32, slab: (SLAB_ROWS, SLAB_COLS) f32 -> (mu, logvar)."""
    b = x.shape[0]
    mp_need = -(-b // PACK)                 # packed rows needed
    tm = _choose_tile(mp_need)
    mp = _round_up(mp_need, tm)             # total packed rows (multiple of tm)
    bp = mp * PACK
    if bp != b:
        x = jnp.pad(x, ((0, bp - b), (0, 0)))
    xp = x.reshape(mp, PACK * NUM_VARS)     # free row-major reshape: PACK samples / row
    grid = (mp // tm,)

    out_cols = PACK * 2 * NUM_LATENT        # 128
    flops = 2 * mp * PACK * NUM_HIDDEN * (PACK * NUM_VARS + 4 * PACK * NUM_HIDDEN)
    transcendentals = 3 * mp * PACK * NUM_HIDDEN
    bytes_accessed = 4 * (mp * PACK * NUM_VARS + mp * out_cols + SLAB_ROWS * SLAB_COLS)

    out = pl.pallas_call(
        _encoder_kernel,
        out_shape=jax.ShapeDtypeStruct((mp, out_cols), jnp.float32),
        grid=grid,
        in_specs=[
            pl.BlockSpec((tm, PACK * NUM_VARS), lambda i: (i, 0)),    # packed X tile
            pl.BlockSpec((SLAB_ROWS, SLAB_COLS), lambda i: (0, 0)),   # params, resident
        ],
        out_specs=pl.BlockSpec((tm, out_cols), lambda i: (i, 0)),     # 128-lane dense
        compiler_params=pltpu.CompilerParams(
            dimension_semantics=("parallel",)),
        cost_estimate=pl.CostEstimate(
            flops=flops, transcendentals=transcendentals,
            bytes_accessed=bytes_accessed),
    )(xp, slab)

    flat = out.reshape(bp, 2 * NUM_LATENT)[:b]     # free reshape, trim batch padding
    return flat[:, :NUM_LATENT], flat[:, NUM_LATENT:]


# ---- parameter construction ---------------------------------------------------
def init_params(key):
    """Deterministic init mimicking nn.Linear's U(-1/sqrt(fan_in), 1/sqrt(fan_in)).
    Weights stored pre-transposed as (in_features, out_features)."""
    def linear(key, fan_in, fan_out):
        kw, kb = jax.random.split(key)
        bound = 1.0 / jnp.sqrt(jnp.float32(fan_in))
        w = jax.random.uniform(kw, (fan_in, fan_out), jnp.float32, -bound, bound)
        b = jax.random.uniform(kb, (1, fan_out), jnp.float32, -bound, bound)
        return w, b

    keys = jax.random.split(key, 6)
    w1, b1 = linear(keys[0], NUM_VARS, NUM_HIDDEN)
    w2, b2 = linear(keys[1], NUM_HIDDEN, NUM_HIDDEN)
    w3, b3 = linear(keys[2], NUM_HIDDEN, NUM_HIDDEN)
    w4, b4 = linear(keys[3], NUM_HIDDEN, NUM_LATENT)
    wmu, bmu = linear(keys[4], NUM_LATENT, NUM_LATENT)
    wlv, blv = linear(keys[5], NUM_LATENT, NUM_LATENT)
    return dict(w1=w1, b1=b1, w2=w2, b2=b2, w3=w3, b3=b3, w4=w4, b4=b4,
                wmu=wmu, bmu=bmu, wlv=wlv, blv=blv)


def _block_diag(w):
    """PACK copies of w along the diagonal: (k, n) -> (PACK*k, PACK*n)."""
    return jnp.kron(jnp.eye(PACK, dtype=w.dtype), w)


def pack_params(p):
    """Pack all weights/biases (PACK-way block-diagonal) into one f32 slab."""
    H, L = NUM_HIDDEN, NUM_LATENT
    # Linear(32,16): zero-padded to 32 output lanes.
    w4 = jnp.zeros((H, H), jnp.float32).at[:, :L].set(p["w4"])
    b4 = jnp.zeros((1, H), jnp.float32).at[:, :L].set(p["b4"])
    # Fused heads: rows 0:16 hold [wmu | wlv]; rows 16:32 stay zero.
    wh = jnp.zeros((H, H), jnp.float32).at[:L, :L].set(p["wmu"]).at[:L, L:].set(p["wlv"])
    bh = jnp.concatenate([p["bmu"], p["blv"]], axis=1)

    slab = jnp.zeros((SLAB_ROWS, SLAB_COLS), jnp.float32)
    for name, w, b in (("1", p["w1"], p["b1"]),
                       ("2", p["w2"], p["b2"]),
                       ("3", p["w3"], p["b3"]),
                       ("4", w4, b4),
                       ("h", wh, bh)):
        wo, bo = OFF["w" + name], OFF["b" + name]
        wb = _block_diag(w)
        slab = slab.at[wo:wo + wb.shape[0], :].set(wb)
        slab = slab.at[bo:bo + 1, :].set(jnp.tile(b, (1, PACK)))
    return slab


def encoder_reference(x, p):
    """Pure-JAX reference of the PyTorch forward (correctness check)."""
    h = jnp.tanh(x @ p["w1"] + p["b1"])
    h = jnp.tanh(h @ p["w2"] + p["b2"])
    h = jnp.tanh(h @ p["w3"] + p["b3"])
    z = h @ p["w4"] + p["b4"]
    return z @ p["wmu"] + p["bmu"], z @ p["wlv"] + p["blv"]


if __name__ == "__main__":
    key = jax.random.PRNGKey(0)
    k_x, k_p = jax.random.split(key)

    x = jax.random.normal(k_x, (BATCH, NUM_VARS), jnp.float32)
    params = init_params(k_p)
    slab = pack_params(params)

    mu, logvar = encoder_forward(x, slab)
    jax.block_until_ready((mu, logvar))

    mu_ref, lv_ref = encoder_reference(x, params)
    assert mu.shape == (BATCH, NUM_LATENT) and logvar.shape == (BATCH, NUM_LATENT)
    assert jnp.allclose(mu, mu_ref, atol=1e-5, rtol=1e-5)
    assert jnp.allclose(logvar, lv_ref, atol=1e-5, rtol=1e-5)

    print("KERNEL_OK")
</pallas_src>

<mosaic_0001>
module attributes {stable_mosaic.version = 11 : i64} {
  func.func @_encoder_kernel(%arg0: i32, %arg1: memref<8x256xf32, #tpu.memory_space<vmem>>, %arg2: memref<808x128xf32, #tpu.memory_space<vmem>>, %arg3: memref<8x128xf32, #tpu.memory_space<vmem>>) attributes {dimension_semantics = [#tpu.dimension_semantics<parallel>], iteration_bounds = array<i64: 1>, scalar_prefetch = 0 : i64, scratch_operands = 0 : i64, tpu.core_type = #tpu.core_type<tc>, window_params = [{transform_indices = @transform_0, window_bounds = array<i64: 8, 256>}, {pipeline_mode = #tpu.pipeline_mode<synchronous>, transform_indices = @transform_1, window_bounds = array<i64: 808, 128>}, {transform_indices = @transform_2, window_bounds = array<i64: 8, 128>}]} {
    %c0 = arith.constant 0 : index
    %c0_0 = arith.constant 0 : index
    %0 = vector.load %arg1[%c0, %c0_0] : memref<8x256xf32, #tpu.memory_space<vmem>>, vector<8x256xf32>
    %c0_1 = arith.constant 0 : index
    %c0_2 = arith.constant 0 : index
    %1 = vector.load %arg2[%c0_1, %c0_2] : memref<808x128xf32, #tpu.memory_space<vmem>>, vector<256x128xf32>
    %c256 = arith.constant 256 : index
    %c0_3 = arith.constant 0 : index
    %2 = vector.load %arg2[%c256, %c0_3] : memref<808x128xf32, #tpu.memory_space<vmem>>, vector<1x128xf32>
    %cst = arith.constant dense<0.000000e+00> : vector<8x128xf32>
    %3 = tpu.matmul %0, %1, %cst {dimension_numbers = #tpu.dot_dimension_numbers<[1], [0], [0], [1], [0, 0, 1, 1], [], []>} : vector<8x256xf32>, vector<256x128xf32>, vector<8x128xf32> -> vector<8x128xf32>
    %4 = vector.broadcast %2 : vector<1x128xf32> to vector<8x128xf32>
    %5 = arith.addf %3, %4 : vector<8x128xf32>
    %6 = math.tanh %5 : vector<8x128xf32>
    %c264 = arith.constant 264 : index
    %c0_4 = arith.constant 0 : index
    %7 = vector.load %arg2[%c264, %c0_4] : memref<808x128xf32, #tpu.memory_space<vmem>>, vector<128x128xf32>
    %c392 = arith.constant 392 : index
    %c0_5 = arith.constant 0 : index
    %8 = vector.load %arg2[%c392, %c0_5] : memref<808x128xf32, #tpu.memory_space<vmem>>, vector<1x128xf32>
    %cst_6 = arith.constant dense<0.000000e+00> : vector<8x128xf32>
    %9 = tpu.matmul %6, %7, %cst_6 {dimension_numbers = #tpu.dot_dimension_numbers<[1], [0], [0], [1], [0, 0, 1, 1], [], []>} : vector<8x128xf32>, vector<128x128xf32>, vector<8x128xf32> -> vector<8x128xf32>
    %10 = vector.broadcast %8 : vector<1x128xf32> to vector<8x128xf32>
    %11 = arith.addf %9, %10 : vector<8x128xf32>
    %12 = math.tanh %11 : vector<8x128xf32>
    %c400 = arith.constant 400 : index
    %c0_7 = arith.constant 0 : index
    %13 = vector.load %arg2[%c400, %c0_7] : memref<808x128xf32, #tpu.memory_space<vmem>>, vector<128x128xf32>
    %c528 = arith.constant 528 : index
    %c0_8 = arith.constant 0 : index
    %14 = vector.load %arg2[%c528, %c0_8] : memref<808x128xf32, #tpu.memory_space<vmem>>, vector<1x128xf32>
    %cst_9 = arith.constant dense<0.000000e+00> : vector<8x128xf32>
    %15 = tpu.matmul %12, %13, %cst_9 {dimension_numbers = #tpu.dot_dimension_numbers<[1], [0], [0], [1], [0, 0, 1, 1], [], []>} : vector<8x128xf32>, vector<128x128xf32>, vector<8x128xf32> -> vector<8x128xf32>
    %16 = vector.broadcast %14 : vector<1x128xf32> to vector<8x128xf32>
    %17 = arith.addf %15, %16 : vector<8x128xf32>
    %18 = math.tanh %17 : vector<8x128xf32>
    %c536 = arith.constant 536 : index
    %c0_10 = arith.constant 0 : index
    %19 = vector.load %arg2[%c536, %c0_10] : memref<808x128xf32, #tpu.memory_space<vmem>>, vector<128x128xf32>
    %c664 = arith.constant 664 : index
    %c0_11 = arith.constant 0 : index
    %20 = vector.load %arg2[%c664, %c0_11] : memref<808x128xf32, #tpu.memory_space<vmem>>, vector<1x128xf32>
    %cst_12 = arith.constant dense<0.000000e+00> : vector<8x128xf32>
    %21 = tpu.matmul %18, %19, %cst_12 {dimension_numbers = #tpu.dot_dimension_numbers<[1], [0], [0], [1], [0, 0, 1, 1], [], []>} : vector<8x128xf32>, vector<128x128xf32>, vector<8x128xf32> -> vector<8x128xf32>
    %22 = vector.broadcast %20 : vector<1x128xf32> to vector<8x128xf32>
    %23 = arith.addf %21, %22 : vector<8x128xf32>
    %c672 = arith.constant 672 : index
    %c0_13 = arith.constant 0 : index
    %24 = vector.load %arg2[%c672, %c0_13] : memref<808x128xf32, #tpu.memory_space<vmem>>, vector<128x128xf32>
    %c800 = arith.constant 800 : index
    %c0_14 = arith.constant 0 : index
    %25 = vector.load %arg2[%c800, %c0_14] : memref<808x128xf32, #tpu.memory_space<vmem>>, vector<1x128xf32>
    %cst_15 = arith.constant dense<0.000000e+00> : vector<8x128xf32>
    %26 = tpu.matmul %23, %24, %cst_15 {dimension_numbers = #tpu.dot_dimension_numbers<[1], [0], [0], [1], [0, 0, 1, 1], [], []>} : vector<8x128xf32>, vector<128x128xf32>, vector<8x128xf32> -> vector<8x128xf32>
    %27 = vector.broadcast %25 : vector<1x128xf32> to vector<8x128xf32>
    %28 = arith.addf %26, %27 : vector<8x128xf32>
    %c0_16 = arith.constant 0 : index
    %c0_17 = arith.constant 0 : index
    %29 = vector.load %arg3[%c0_16, %c0_17] : memref<8x128xf32, #tpu.memory_space<vmem>>, vector<8x128xf32>
    tpu.vector_store %arg3[%c0_16, %c0_17], %28 {strides = array<i32>} : memref<8x128xf32, #tpu.memory_space<vmem>>, vector<8x128xf32>,
    return
  }
  func.func @transform_0(%arg0: i32) -> (i32, i32) {
    %c0_i32 = arith.constant 0 : i32
    %c0_i32_0 = arith.constant 0 : i32
    return %arg0, %c0_i32 : i32, i32
  }
  func.func @transform_1(%arg0: i32) -> (i32, i32) {
    %c0_i32 = arith.constant 0 : i32
    %c0_i32_0 = arith.constant 0 : i32
    %c0_i32_1 = arith.constant 0 : i32
    return %c0_i32, %c0_i32_0 : i32, i32
  }
  func.func @transform_2(%arg0: i32) -> (i32, i32) {
    %c0_i32 = arith.constant 0 : i32
    %c0_i32_0 = arith.constant 0 : i32
    return %arg0, %c0_i32 : i32, i32
  }
}

</mosaic_0001>

<bundles_post_ra>
// kernel: encoder_forward.1
= control target key start
LH: loop header
LB: loop body
LE: loop exit
PB: predicated region body
PF: predicated region fallthrough
CT: control target
= control target key end

     0   :  { %7 = vsyncpa [#allocation3], 0  ;;  %s919_s9 = smov [#allocation2]   ;;  %s1001_s0 = inlined_call_operand.vmem [shape: f32[8,256], index: 0, kind: input, shape index: {}]   ;;  %s1002_s1 = inlined_call_operand.hbm [shape: f32[808,128], index: 1, kind: input, shape index: {}]   ;;  %s1003_s2 = inlined_call_operand.vmem [shape: f32[8,128], index: 2, kind: output, shape index: {}]  }
   0x1   :  { %s15_s10 = sshll.u32 %s919_s9, 4  ;;  %s895_s13 = scalar_lea.hbm %s1002_s1, 12928  ;;  %s16_s10 = int_to_ptr.vmem [resolvable:$true] %s15_s10 }
   0x2   :  { %p896_p0 = scmp.ne.s32.totalorder %s1002_s1, %s895_s13  ;;  %p899_p1 = scmp.lt.u32.totalorder %s895_s13, %s1002_s1 }
   0x4   :  { %p901_p2 = pnand %p899_p1, %p896_p0 }
   0x6   :  { %904 = shalt.err (!%p901_p2)
}
   0x7   :  { %s905_s18 = scalar_lea.vmem %s16_s10, 12928  ;;  %p910_p4 = scmp.lt.s32.totalorder %s16_s10, %s16_s10 }
   0x8   :  { %p906_p3 = scmp.ne.s32.totalorder %s16_s10, %s905_s18  ;;  %p911_p5 = scmp.lt.s32.totalorder %s905_s18, %s905_s18 }
   0xa   :  { %p912_p6 = por %p911_p5, %p910_p4 }
   0xc   :  { %p913_p7 = pnand %p912_p6, %p906_p3 }
   0xe   :  { %916 = shalt.err (!%p913_p7)
}
   0xf   :  { %s920_s19 = smov 128   ;;  %s921_s20 = smov 8  }
  0x10   :  { %21 = dma.hbm_to_vmem [thread:$0]  %s1002_s1, 12928, %s16_s10, [#allocation3], %s920_s19, %s920_s19, %s921_s20  }
  0x11   :  { %917 = dma.done.wait [#allocation3], 12928  }
  0x12   :  { %918 = vsyncadd [#allocation3], 4294954368  ;;  %v922_v0 = vmov 0.0|0.0   ;;  %v43_v1 = vld [vmem:[#allocation2 + $0x80] sm:$0xff]  ;;  %v44_v2 = vld [vmem:[#allocation2 + $0x88] sm:$0xff]  ;;  %vm923_vm0 = vmmov 0  }
  0x13   :  { %787 = vmatprep.subr.bf16.mxu1 %v922_v0  ;;  %v27_v3 = vld [vmem:[#allocation2] sm:$0xff]  ;;  %v755_v4 = vpack.c.bf16 %v44_v2, %v43_v1  ;;  %v28_v5 = vld [vmem:[#allocation2 + $0x8] sm:$0xff]  ;;  %v45_v6 = vld [vmem:[#allocation2 + $0x90] sm:$0xff] }
  0x14   :  { %v46_v7 = vld [vmem:[#allocation2 + $0x98] sm:$0xff]  ;;  %v757_v8 = vpack.c.bf16 %v28_v5, %v27_v3  ;;  %v29_v10 = vld [vmem:[#allocation2 + $0x10] sm:$0xff]  ;;  %v47_v12 = vld [vmem:[#allocation2 + $0xa0] sm:$0xff] }
  0x15   :  { %v759_v9 = vpack.c.bf16 %v46_v7, %v45_v6  ;;  %v30_v11 = vld [vmem:[#allocation2 + $0x18] sm:$0xff]  ;;  %756 = vmatprep.subr.bf16.mxu0 %v755_v4  ;;  %v48_v13 = vld [vmem:[#allocation2 + $0xa8] sm:$0xff]  ;;  %v31_v16 = vld [vmem:[#allocation2 + $0x20] sm:$0xff] }
  0x16   :  { %758 = vmatpush3.bf16.msra.mxu0 %v757_v8  ;;  %v761_v14 = vpack.c.bf16 %v30_v11, %v29_v10  ;;  %v763_v15 = vpack.c.bf16 %v48_v13, %v47_v12  ;;  %v32_v17 = vld [vmem:[#allocation2 + $0x28] sm:$0xff]  ;;  %v49_v18 = vld [vmem:[#allocation2 + $0xb0] sm:$0xff]  ;;  %v50_v19 = vld [vmem:[#allocation2 + $0xb8] sm:$0xff]  ;;  %v924_v11 = vmov 0.0  }
  0x17   :  { %760 = vmatprep.subr.bf16.mxu0 %v759_v9  ;;  %v765_v20 = vpack.c.bf16 %v32_v17, %v31_v16  ;;  %v767_v21 = vpack.c.bf16 %v50_v19, %v49_v18  ;;  %v33_v22 = vld [vmem:[#allocation2 + $0x30] sm:$0xff]  ;;  %v34_v23 = vld [vmem:[#allocation2 + $0x38] sm:$0xff]  ;;  %v51_v24 = vld [vmem:[#allocation2 + $0xc0] sm:$0xff]  ;;  %647 = vmatprep.mubr.msk.f32.mxu1 %vm923_vm0, %v924_v11 }
  0x18   :  { %v52_v25 = vld [vmem:[#allocation2 + $0xc8] sm:$0xff]  ;;  %v136_v28 = vld [vmem:[#allocation2 + $0x110] sm:$0xff]  ;;  %v769_v29 = vpack.c.bf16 %v34_v23, %v33_v22  ;;  %v137_v31 = vld [vmem:[#allocation2 + $0x118] sm:$0xff] }
  0x19   :  { %v26_v26 = vld [vmem:[%s1001_s0 + $0x8] sm:$0xff]  ;;  %v138_v32 = vld [vmem:[#allocation2 + $0x120] sm:$0xff]  ;;  %v771_v33 = vpack.c.bf16 %v52_v25, %v51_v24  ;;  %v53_v36 = vld [vmem:[#allocation2 + $0xd0] sm:$0xff] }
  0x1a   :  { %762 = vmatpush3.bf16.msra.mxu0 %v761_v14  ;;  %128 = vmatprep.mubr.f32.mxu0 %v26_v26  ;;  %v135_v27 = vld [vmem:[#allocation2 + $0x108] sm:$0xff]  ;;  %v35_v34 = vld [vmem:[#allocation2 + $0x40] sm:$0xff]  ;;  %v54_v37 = vld [vmem:[#allocation2 + $0xd8] sm:$0xff]  ;;  %v791_v38 = vpack.c.bf16 %v138_v32, %v137_v31 }
  0x1b   :  { %764 = vmatprep.subr.bf16.mxu0 %v763_v15  ;;  %v788_v30 = vpack.c.bf16 %v136_v28, %v135_v27  ;;  %v36_v35 = vld [vmem:[#allocation2 + $0x48] sm:$0xff]  ;;  %v140_v40 = vld [vmem:[#allocation2 + $0x130] sm:$0xff]  ;;  %v775_v42 = vpack.c.bf16 %v54_v37, %v53_v36  ;;  %v38_v44 = vld [vmem:[#allocation2 + $0x58] sm:$0xff] }
  0x1c   :  { %v139_v39 = vld [vmem:[#allocation2 + $0x128] sm:$0xff]  ;;  %v773_v41 = vpack.c.bf16 %v36_v35, %v35_v34  ;;  %v37_v43 = vld [vmem:[#allocation2 + $0x50] sm:$0xff]  ;;  %v55_v45 = vld [vmem:[#allocation2 + $0xe0] sm:$0xff] }
  0x1d   :  { %789 = vmatpush3.bf16.msra.mxu1 %v788_v30  ;;  %v56_v46 = vld [vmem:[#allocation2 + $0xe8] sm:$0xff]  ;;  %v794_v47 = vpack.c.bf16 %v140_v40, %v139_v39  ;;  %v141_v48 = vld [vmem:[#allocation2 + $0x138] sm:$0xff]  ;;  %v142_v49 = vld [vmem:[#allocation2 + $0x140] sm:$0xff]  ;;  %v777_v50 = vpack.c.bf16 %v38_v44, %v37_v43 }
  0x1e   :  { %766 = vmatpush3.bf16.msra.mxu0 %v765_v20  ;;  %790 = vmatprep.subr.bf16.mxu1 %v922_v0  ;;  %v779_v51 = vpack.c.bf16 %v56_v46, %v55_v45  ;;  %v39_v52 = vld [vmem:[#allocation2 + $0x60] sm:$0xff]  ;;  %v40_v53 = vld [vmem:[#allocation2 + $0x68] sm:$0xff]  ;;  %v57_v54 = vld [vmem:[#allocation2 + $0xf0] sm:$0xff]  ;;  %v797_v56 = vpack.c.bf16 %v142_v49, %v141_v48 }
  0x1f   :  { %768 = vmatprep.subr.bf16.mxu0 %v767_v21  ;;  %v58_v55 = vld [vmem:[#allocation2 + $0xf8] sm:$0xff]  ;;  %v781_v57 = vpack.c.bf16 %v40_v53, %v39_v52  ;;  %v41_v59 = vld [vmem:[#allocation2 + $0x70] sm:$0xff]  ;;  %v25_v62 = vld [vmem:[%s1001_s0] sm:$0xff] }
  0x20   :  { %v783_v58 = vpack.c.bf16 %v58_v55, %v57_v54  ;;  %v42_v60 = vld [vmem:[#allocation2 + $0x78] sm:$0xff]  ;;  %v143_v63 = vld [vmem:[#allocation2 + $0x148] sm:$0xff]  ;;  %v144_v1 = vld [vmem:[#allocation2 + $0x150] sm:$0xff] }
  0x21   :  { %792 = vmatpush3.bf16.msra.mxu1 %v791_v38  ;;  %v785_v61 = vpack.c.bf16 %v42_v60, %v41_v59  ;;  %v800_v2 = vpack.c.bf16 %v144_v1, %v143_v63  ;;  %v145_v3 = vld [vmem:[#allocation2 + $0x158] sm:$0xff]  ;;  %v146_v4 = vld [vmem:[#allocation2 + $0x160] sm:$0xff]  ;;  %v147_v6 = vld [vmem:[#allocation2 + $0x168] sm:$0xff] }
  0x22   :  { %770 = vmatpush3.bf16.msra.mxu0 %v769_v29  ;;  %793 = vmatprep.subr.bf16.mxu1 %v922_v0  ;;  %v803_v5 = vpack.c.bf16 %v146_v4, %v145_v3  ;;  %v148_v7 = vld [vmem:[#allocation2 + $0x170] sm:$0xff]  ;;  %v149_v9 = vld [vmem:[#allocation2 + $0x178] sm:$0xff]  ;;  %v150_v10 = vld [vmem:[#allocation2 + $0x180] sm:$0xff] }
  0x23   :  { %772 = vmatprep.subr.bf16.mxu0 %v771_v33  ;;  %v806_v8 = vpack.c.bf16 %v148_v7, %v147_v6  ;;  %v809_v12 = vpack.c.bf16 %v150_v10, %v149_v9  ;;  %v227_v13 = vld [vmem:[#allocation2 + $0x190] sm:$0xff]  ;;  %v228_v14 = vld [vmem:[#allocation2 + $0x198] sm:$0xff]  ;;  %v229_v15 = vld [vmem:[#allocation2 + $0x1a0] sm:$0xff] }
  0x24   :  { %v812_v16 = vpack.c.bf16 %v228_v14, %v227_v13  ;;  %v230_v17 = vld [vmem:[#allocation2 + $0x1a8] sm:$0xff]  ;;  %v231_v19 = vld [vmem:[#allocation2 + $0x1b0] sm:$0xff]  ;;  %v232_v20 = vld [vmem:[#allocation2 + $0x1b8] sm:$0xff] }
  0x25   :  { %795 = vmatpush3.bf16.msra.mxu1 %v794_v47  ;;  %v815_v18 = vpack.c.bf16 %v230_v17, %v229_v15  ;;  %v818_v21 = vpack.c.bf16 %v232_v20, %v231_v19  ;;  %v233_v22 = vld [vmem:[#allocation2 + $0x1c0] sm:$0xff]  ;;  %v234_v23 = vld [vmem:[#allocation2 + $0x1c8] sm:$0xff]  ;;  %v235_v25 = vld [vmem:[#allocation2 + $0x1d0] sm:$0xff] }
  0x26   :  { %774 = vmatpush3.bf16.msra.mxu0 %v773_v41  ;;  %796 = vmatprep.subr.bf16.mxu1 %v922_v0  ;;  %v821_v24 = vpack.c.bf16 %v234_v23, %v233_v22  ;;  %v236_v26 = vld [vmem:[#allocation2 + $0x1d8] sm:$0xff]  ;;  %v507_v29 = vld [vmem:[#allocation2 + $0x100] ss:$0 sm:$0xff]  ;;  %v238_v35 = vld [vmem:[#allocation2 + $0x1e8] sm:$0xff] }
  0x27   :  { %776 = vmatprep.subr.bf16.mxu0 %v775_v42  ;;  %v824_v27 = vpack.c.bf16 %v236_v26, %v235_v25  ;;  %v237_v34 = vld [vmem:[#allocation2 + $0x1e0] sm:$0xff]  ;;  %v239_v37 = vld [vmem:[#allocation2 + $0x1f0] sm:$0xff]  ;;  %v240_v38 = vld [vmem:[#allocation2 + $0x1f8] sm:$0xff] }
  0x28   :  { %v827_v36 = vpack.c.bf16 %v238_v35, %v237_v34  ;;  %v830_v39 = vpack.c.bf16 %v240_v38, %v239_v37  ;;  %v241_v40 = vld [vmem:[#allocation2 + $0x200] sm:$0xff]  ;;  %v242_v41 = vld [vmem:[#allocation2 + $0x208] sm:$0xff]  ;;  %v319_v43 = vld [vmem:[#allocation2 + $0x218] sm:$0xff] }
  0x29   :  { %798 = vmatpush3.bf16.msra.mxu1 %v797_v56  ;;  %v833_v42 = vpack.c.bf16 %v242_v41, %v241_v40  ;;  %v320_v44 = vld [vmem:[#allocation2 + $0x220] sm:$0xff]  ;;  %v321_v45 = vld [vmem:[#allocation2 + $0x228] sm:$0xff]  ;;  %v322_v47 = vld [vmem:[#allocation2 + $0x230] sm:$0xff] }
  0x2a   :  { %778 = vmatpush3.bf16.msra.mxu0 %v777_v50  ;;  %799 = vmatprep.subr.bf16.mxu1 %v922_v0  ;;  %v836_v46 = vpack.c.bf16 %v320_v44, %v319_v43  ;;  %v839_v48 = vpack.c.bf16 %v322_v47, %v321_v45  ;;  %v323_v49 = vld [vmem:[#allocation2 + $0x238] sm:$0xff]  ;;  %v324_v50 = vld [vmem:[#allocation2 + $0x240] sm:$0xff]  ;;  %v325_v52 = vld [vmem:[#allocation2 + $0x248] sm:$0xff] }
  0x2b   :  { %780 = vmatprep.subr.bf16.mxu0 %v779_v51  ;;  %v842_v51 = vpack.c.bf16 %v324_v50, %v323_v49  ;;  %v326_v53 = vld [vmem:[#allocation2 + $0x250] sm:$0xff]  ;;  %v327_v55 = vld [vmem:[#allocation2 + $0x258] sm:$0xff]  ;;  %v328_v56 = vld [vmem:[#allocation2 + $0x260] sm:$0xff] }
  0x2c   :  { %v845_v54 = vpack.c.bf16 %v326_v53, %v325_v52  ;;  %v329_v63 = vld [vmem:[#allocation2 + $0x268] sm:$0xff]  ;;  %v330_v1 = vld [vmem:[#allocation2 + $0x270] sm:$0xff]  ;;  %v331_v3 = vld [vmem:[#allocation2 + $0x278] sm:$0xff] }
  0x2d   :  { %801 = vmatpush3.bf16.msra.mxu1 %v800_v2  ;;  %v851_v2 = vpack.c.bf16 %v330_v1, %v329_v63  ;;  %v332_v4 = vld [vmem:[#allocation2 + $0x280] sm:$0xff]  ;;  %v333_v6 = vld [vmem:[#allocation2 + $0x288] sm:$0xff]  ;;  %v334_v7 = vld [vmem:[#allocation2 + $0x290] sm:$0xff] }
  0x2e   :  { %782 = vmatpush3.bf16.msra.mxu0 %v781_v57  ;;  %802 = vmatprep.subr.bf16.mxu1 %v922_v0  ;;  %v848_v57 = vpack.c.bf16 %v328_v56, %v327_v55  ;;  %v410_v9 = vld [vmem:[#allocation2 + $0x2a0] sm:$0xff]  ;;  %v411_v10 = vld [vmem:[#allocation2 + $0x2a8] sm:$0xff]  ;;  %v413_v13 = vld [vmem:[#allocation2 + $0x2b8] sm:$0xff] }
  0x2f   :  { %784 = vmatprep.subr.bf16.mxu0 %v783_v58  ;;  %v508_v58 = vld [vmem:[#allocation2 + $0x188] ss:$0 sm:$0xff]  ;;  %v414_v15 = vld [vmem:[#allocation2 + $0x2c0] sm:$0xff]  ;;  %v417_v19 = vld [vmem:[#allocation2 + $0x2d8] sm:$0xff] }
  0x30   :  { %v419_v22 = vld [vmem:[#allocation2 + $0x2e8] sm:$0xff]  ;;  %v421_v25 = vld [vmem:[#allocation2 + $0x2f8] sm:$0xff]  ;;  %v424_v35 = vld [vmem:[#allocation2 + $0x310] sm:$0xff] }
  0x31   :  { %804 = vmatpush3.bf16.msra.mxu1 %v803_v5  ;;  %v854_v5 = vpack.c.bf16 %v332_v4, %v331_v3  ;;  %v510_v38 = vld [vmem:[#allocation2 + $0x298] ss:$0 sm:$0xff] }
  0x32   :  { %786 = vmatpush3.bf16.msra.mxu0 %v785_v61  ;;  %805 = vmatprep.subr.bf16.mxu1 %v922_v0 }
  0x33   :  { %811 = vmatprep.subr.bf16.mxu0 %v922_v0 }
  0x35   :  { %129 = vmatmul.mubr.f32.vlgmr.msra.gmra.mrb[0].mxu0 %v25_v62  ;;  %807 = vmatpush3.bf16.msra.mxu1 %v806_v8  ;;  %v857_v8 = vpack.c.bf16 %v334_v7, %v333_v6 }
  0x36   :  { %682 = vmatprep.mubr.msk.f32.mxu0 %vm923_vm0, %v924_v11  ;;  %808 = vmatprep.subr.bf16.mxu1 %v922_v0 }
  0x37   :  { %813 = vmatpush3.bf16.msra.mxu0 %v812_v16  ;;  %v415_v16 = vld [vmem:[#allocation2 + $0x2c8] sm:$0xff] }
  0x38   :  { %814 = vmatprep.subr.bf16.mxu0 %v922_v0  ;;  %v866_v17 = vpack.c.bf16 %v415_v16, %v414_v15 }
  0x39   :  { %810 = vmatpush3.bf16.msra.mxu1 %v809_v12  ;;  %v412_v12 = vld [vmem:[#allocation2 + $0x2b0] sm:$0xff] }
  0x3a   :  { %835 = vmatprep.subr.bf16.mxu1 %v922_v0  ;;  %v863_v14 = vpack.c.bf16 %v413_v13, %v412_v12 }
  0x3b   :  { %816 = vmatpush3.bf16.msra.mxu0 %v815_v18  ;;  %v416_v18 = vld [vmem:[#allocation2 + $0x2d0] sm:$0xff] }
  0x3c   :  { %817 = vmatprep.subr.bf16.mxu0 %v922_v0  ;;  %v869_v20 = vpack.c.bf16 %v417_v19, %v416_v18 }
  0x3f   :  { %819 = vmatpush3.bf16.msra.mxu0 %v818_v21  ;;  %v418_v21 = vld [vmem:[#allocation2 + $0x2e0] sm:$0xff] }
  0x40   :  { %820 = vmatprep.subr.bf16.mxu0 %v922_v0  ;;  %v872_v23 = vpack.c.bf16 %v419_v22, %v418_v21 }
  0x43   :  { %822 = vmatpush3.bf16.msra.mxu0 %v821_v24  ;;  %v420_v24 = vld [vmem:[#allocation2 + $0x2f0] sm:$0xff] }
  0x44   :  { %823 = vmatprep.subr.bf16.mxu0 %v922_v0  ;;  %v875_v26 = vpack.c.bf16 %v421_v25, %v420_v24 }
  0x47   :  { %825 = vmatpush3.bf16.msra.mxu0 %v824_v27  ;;  %v422_v27 = vld [vmem:[#allocation2 + $0x300] sm:$0xff] }
  0x48   :  { %826 = vmatprep.subr.bf16.mxu0 %v922_v0 }
  0x4b   :  { %828 = vmatpush3.bf16.msra.mxu0 %v827_v36  ;;  %v425_v36 = vld [vmem:[#allocation2 + $0x318] sm:$0xff] }
  0x4c   :  { %829 = vmatprep.subr.bf16.mxu0 %v922_v0  ;;  %v881_v37 = vpack.c.bf16 %v425_v36, %v424_v35 }
  0x4f   :  { %831 = vmatpush3.bf16.msra.mxu0 %v830_v39 }
  0x50   :  { %832 = vmatprep.subr.bf16.mxu0 %v922_v0 }
  0x53   :  { %834 = vmatpush3.bf16.msra.mxu0 %v833_v42  ;;  %v511_v42 = vld [vmem:[#allocation2 + $0x320] ss:$0 sm:$0xff] }
  0x54   :  { %859 = vmatprep.subr.bf16.mxu0 %v922_v0 }
 0x108   :  { %v544_v28 = vpop.f32.mrb[0].mxu0 }
 0x109   :  { %v545_v30 = vpop.f32.mrb[1].mxu0 }
 0x10a   :  { %v546_v31 = vadd.f32 %v545_v30, %v544_v28  ;;  %v423_v28 = vld [vmem:[#allocation2 + $0x308] sm:$0xff]  ;;  %v509_v30 = vld [vmem:[#allocation2 + $0x210] ss:$0 sm:$0xff] }
 0x10c   :  { %v131_v32 = vadd.f32 %v546_v31, %v507_v29  ;;  %v878_v29 = vpack.c.bf16 %v423_v28, %v422_v27 }
 0x10e   :  { %889 = vtanh.f32 %v131_v32 }
 0x118   :  { %v890_v33 = vpop.eup %889 }
 0x119   :  { %648 = vmatmul.mubr.f32.vlgmr.msra.gmra.mrb[0].mxu1 %v890_v33 }
 0x11a   :  { %717 = vmatprep.mubr.msk.f32.mxu1 %vm923_vm0, %v924_v11  ;;  %837 = vmatpush3.bf16.msra.mxu1 %v836_v46 }
 0x11b   :  { %838 = vmatprep.subr.bf16.mxu1 %v922_v0 }
 0x11e   :  { %840 = vmatpush3.bf16.msra.mxu1 %v839_v48 }
 0x11f   :  { %841 = vmatprep.subr.bf16.mxu1 %v922_v0 }
 0x122   :  { %843 = vmatpush3.bf16.msra.mxu1 %v842_v51 }
 0x123   :  { %844 = vmatprep.subr.bf16.mxu1 %v922_v0 }
 0x126   :  { %846 = vmatpush3.bf16.msra.mxu1 %v845_v54 }
 0x127   :  { %847 = vmatprep.subr.bf16.mxu1 %v922_v0 }
 0x12a   :  { %849 = vmatpush3.bf16.msra.mxu1 %v848_v57 }
 0x12b   :  { %850 = vmatprep.subr.bf16.mxu1 %v922_v0 }
 0x12e   :  { %852 = vmatpush3.bf16.msra.mxu1 %v851_v2 }
 0x12f   :  { %853 = vmatprep.subr.bf16.mxu1 %v922_v0 }
 0x132   :  { %855 = vmatpush3.bf16.msra.mxu1 %v854_v5 }
 0x133   :  { %856 = vmatprep.subr.bf16.mxu1 %v922_v0 }
 0x136   :  { %858 = vmatpush3.bf16.msra.mxu1 %v857_v8 }
 0x1ec   :  { %v222_v59 = vpop.f32.mrb[0].mxu1 }
 0x1ed   :  { %v223_v60 = vadd.f32 %v508_v58, %v222_v59  ;;  %v649_v61 = vpop.f32.mrb[1].mxu1 }
 0x1ef   :  { %891 = vtanh.f32 %v223_v60 }
 0x1f9   :  { %v892_v62 = vpop.eup %891 }
 0x1fa   :  { %683 = vmatmul.mubr.f32.vlgmr.msra.gmra.mrb[2].mxu0 %v892_v62 }
 0x1fb   :  { %752 = vmatprep.mubr.msk.f32.mxu0 %vm923_vm0, %v924_v11  ;;  %v860_v11 = vpack.c.bf16 %v411_v10, %v410_v9 }
 0x1fd   :  { %861 = vmatpush3.bf16.msra.mxu0 %v860_v11 }
 0x1fe   :  { %862 = vmatprep.subr.bf16.mxu0 %v922_v0 }
 0x201   :  { %864 = vmatpush3.bf16.msra.mxu0 %v863_v14 }
 0x202   :  { %865 = vmatprep.subr.bf16.mxu0 %v922_v0 }
 0x205   :  { %867 = vmatpush3.bf16.msra.mxu0 %v866_v17 }
 0x206   :  { %868 = vmatprep.subr.bf16.mxu0 %v922_v0 }
 0x209   :  { %870 = vmatpush3.bf16.msra.mxu0 %v869_v20 }
 0x20a   :  { %871 = vmatprep.subr.bf16.mxu0 %v922_v0 }
 0x20d   :  { %873 = vmatpush3.bf16.msra.mxu0 %v872_v23 }
 0x20e   :  { %874 = vmatprep.subr.bf16.mxu0 %v922_v0 }
 0x211   :  { %876 = vmatpush3.bf16.msra.mxu0 %v875_v26 }
 0x212   :  { %877 = vmatprep.subr.bf16.mxu0 %v922_v0 }
 0x215   :  { %879 = vmatpush3.bf16.msra.mxu0 %v878_v29 }
 0x216   :  { %880 = vmatprep.subr.bf16.mxu0 %v922_v0 }
 0x219   :  { %882 = vmatpush3.bf16.msra.mxu0 %v881_v37 }
 0x2cd   :  { %v314_v31 = vpop.f32.mrb[2].mxu0 }
 0x2ce   :  { %v315_v32 = vadd.f32 %v509_v30, %v314_v31  ;;  %v684_v33 = vpop.f32.mrb[3].mxu0 }
 0x2d0   :  { %893 = vtanh.f32 %v315_v32 }
 0x2da   :  { %v894_v34 = vpop.eup %893 }
 0x2db   :  { %718 = vmatmul.mubr.f32.vlgmr.msra.gmra.mrb[2].mxu1 %v894_v34 }
 0x3ae   :  { %v406_v39 = vpop.f32.mrb[2].mxu1 }
 0x3af   :  { %v407_v40 = vadd.f32 %v510_v38, %v406_v39  ;;  %v719_v41 = vpop.f32.mrb[3].mxu1 }
 0x3b1   :  { %753 = vmatmul.mubr.f32.vlgmr.msra.gmra.mrb[4].mxu0 %v407_v40 }
 0x484   :  { %v497_v43 = vpop.f32.mrb[4].mxu0 }
 0x485   :  { %v498_v44 = vadd.f32 %v511_v42, %v497_v43  ;;  %v754_v0 = vpop.f32.mrb[5].mxu0 }
 0x487   :  { %501 = vst [vmem:[%s1003_s2] sm:$0xff] %v498_v44 }
 0x488   :  { %506 = vsyncpa [#allocation3], 1 }

</bundles_post_ra>
